<compile_context>
chip_gen: v7x
topology: tpu7x:2x2x1
jax: 0.10.0
libtpu: 0.0.40
codegen_flags: <defaults>
</compile_context>

<pallas_src>
import jax
import jax.numpy as jnp
from jax.experimental import pallas as pl
from jax.experimental.pallas import tpu as pltpu

LANE = 128        # TPU lane width: the hidden dim is padded to this
MAX_TILE_B = 512  # batch tile cap: bounds VMEM use and ragged-tile waste


def _mlp_kernel(x_ref, w0_ref, b0_ref, w1_ref, b1_ref, o_ref):
    # x arrives as f32 (HBM-cheap); cast to bf16 only for the MXU.
    x = x_ref[...].astype(jnp.bfloat16)                     # (tile_b, 100)
    # lin0 (bf16 MXU, f32 accumulate) + bias + ReLU in f32; h is lane-dense (128)
    h = jnp.dot(x, w0_ref[...], preferred_element_type=jnp.float32)
    h = jnp.maximum(h + b0_ref[...], 0.0)
    # drop0: identity at inference time (Dropout(p=0.3) only active in training)
    # TODO(synk): training-mode dropout (PRNG mask) not implemented.
    # lin1 (bf16 MXU, f32 accumulate) + bias + ReLU; output stays 50 wide.
    y = jnp.dot(h.astype(jnp.bfloat16), w1_ref[...],
                preferred_element_type=jnp.float32)
    y = jnp.maximum(y + b1_ref[...], 0.0)
    o_ref[...] = y.astype(o_ref.dtype)


def _round_up(n, m):
    return ((n + m - 1) // m) * m


def tiny_fully_connected(x, w0, b0, w1, b1):
    """x: [B, 100] f32 -> [B, 50] f32, fused MLP in one batch-tiled Pallas kernel.

    w0: [100, 100], b0: [1, 100], w1: [100, 50], b1: [1, 50]  (all f32, [in, out]).
    """
    B, d_in = x.shape
    d_hidden = w0.shape[1]
    d_out = w1.shape[1]
    d_hidden_pad = _round_up(d_hidden, LANE)           # lane-dense hidden (128)

    # Batch tiling: sublane-aligned tile, >=2 grid steps once the batch has >=16
    # rows (megacore on v7x), ragged final block handles any remainder (no padding).
    padded_rows = _round_up(B, 8)
    if padded_rows >= 16:
        tile_b = min(MAX_TILE_B, _round_up(pl.cdiv(padded_rows, 2), 8))
    else:
        tile_b = padded_rows
    grid = (pl.cdiv(B, tile_b),)

    # Weights/biases are tiny: pad hidden dim to 128 with zeros and pre-cast the
    # matmul operands to bf16 (one-time, negligible bytes). x stays f32.
    w0_bf = jnp.pad(w0, ((0, 0), (0, d_hidden_pad - d_hidden))).astype(jnp.bfloat16)
    b0_f = jnp.pad(b0, ((0, 0), (0, d_hidden_pad - d_hidden))).astype(jnp.float32)
    w1_bf = jnp.pad(w1, ((0, d_hidden_pad - d_hidden), (0, 0))).astype(jnp.bfloat16)
    b1_f = b1.astype(jnp.float32)

    flops = 2 * B * (d_in * d_hidden_pad + d_hidden_pad * d_out)
    bytes_accessed = (x.size * 4                 # f32 input, read once by the kernel
                      + w0_bf.size * 2 + w1_bf.size * 2
                      + b0_f.size * 4 + b1_f.size * 4
                      + B * d_out * 4)           # f32 output, 50 wide, no slice copy

    out = pl.pallas_call(
        _mlp_kernel,
        out_shape=jax.ShapeDtypeStruct((B, d_out), jnp.float32),
        grid_spec=pltpu.PrefetchScalarGridSpec(
            num_scalar_prefetch=0,
            grid=grid,
            in_specs=[
                pl.BlockSpec((tile_b, d_in), lambda i: (i, 0)),          # x: batch-tiled
                pl.BlockSpec((d_in, d_hidden_pad), lambda i: (0, 0)),    # w0: VMEM-resident
                pl.BlockSpec((1, d_hidden_pad), lambda i: (0, 0)),       # b0
                pl.BlockSpec((d_hidden_pad, d_out), lambda i: (0, 0)),   # w1
                pl.BlockSpec((1, d_out), lambda i: (0, 0)),              # b1
            ],
            out_specs=pl.BlockSpec((tile_b, d_out), lambda i: (i, 0)),   # 50-wide f32 out
        ),
        compiler_params=pltpu.CompilerParams(
            dimension_semantics=("parallel",),
        ),
        cost_estimate=pl.CostEstimate(
            flops=flops, transcendentals=0, bytes_accessed=bytes_accessed),
    )(x, w0_bf, b0_f, w1_bf, b1_f)

    return out


def init_params(key, sizes=(100, 100, 50)):
    """Deterministic PyTorch-Linear-style init (uniform(-1/sqrt(fan_in), 1/sqrt(fan_in)))."""
    params = []
    for i in range(len(sizes) - 1):
        fan_in, fan_out = sizes[i], sizes[i + 1]
        key, kw, kb = jax.random.split(key, 3)
        bound = 1.0 / jnp.sqrt(fan_in)
        # stored as [in, out] so the kernel does x @ W
        w = jax.random.uniform(kw, (fan_in, fan_out), jnp.float32, -bound, bound)
        b = jax.random.uniform(kb, (1, fan_out), jnp.float32, -bound, bound)
        params.append((w, b))
    return params


if __name__ == "__main__":
    key = jax.random.PRNGKey(0)
    key, kx = jax.random.split(key)

    B = 8
    x = jax.random.normal(kx, (B, 100), jnp.float32)
    (w0, b0), (w1, b1) = init_params(key)

    out = tiny_fully_connected(x, w0, b0, w1, b1)
    out = jax.block_until_ready(out)

    # reference check in plain JAX f32 (eval-mode semantics); bf16 matmul inputs in the
    # kernel -> loosened tolerance.
    ref = jnp.maximum(jnp.maximum(x @ w0 + b0, 0.0) @ w1 + b1, 0.0)
    assert out.shape == (B, 50)
    assert jnp.allclose(out, ref, atol=2e-2, rtol=2e-2), float(jnp.max(jnp.abs(out - ref)))

    print("KERNEL_OK")
</pallas_src>

<mosaic_0001>
module attributes {stable_mosaic.version = 11 : i64} {
  func.func @_mlp_kernel(%arg0: i32, %arg1: memref<8x100xf32, #tpu.memory_space<vmem>>, %arg2: memref<100x128xbf16, #tpu.memory_space<vmem>>, %arg3: memref<1x128xf32, #tpu.memory_space<vmem>>, %arg4: memref<128x50xbf16, #tpu.memory_space<vmem>>, %arg5: memref<1x50xf32, #tpu.memory_space<vmem>>, %arg6: memref<8x50xf32, #tpu.memory_space<vmem>>) attributes {dimension_semantics = [#tpu.dimension_semantics<parallel>], iteration_bounds = array<i64: 1>, scalar_prefetch = 0 : i64, scratch_operands = 0 : i64, tpu.core_type = #tpu.core_type<tc>, window_params = [{transform_indices = @transform_0, window_bounds = array<i64: 8, 100>}, {pipeline_mode = #tpu.pipeline_mode<synchronous>, transform_indices = @transform_1, window_bounds = array<i64: 100, 128>}, {pipeline_mode = #tpu.pipeline_mode<synchronous>, transform_indices = @transform_2, window_bounds = array<i64: 1, 128>}, {pipeline_mode = #tpu.pipeline_mode<synchronous>, transform_indices = @transform_3, window_bounds = array<i64: 128, 50>}, {pipeline_mode = #tpu.pipeline_mode<synchronous>, transform_indices = @transform_4, window_bounds = array<i64: 1, 50>}, {transform_indices = @transform_5, window_bounds = array<i64: 8, 50>}]} {
    %c0 = arith.constant 0 : index
    %c0_0 = arith.constant 0 : index
    %0 = vector.load %arg1[%c0, %c0_0] : memref<8x100xf32, #tpu.memory_space<vmem>>, vector<8x100xf32>
    %1 = arith.truncf %0 : vector<8x100xf32> to vector<8x100xbf16>
    %c0_1 = arith.constant 0 : index
    %c0_2 = arith.constant 0 : index
    %2 = vector.load %arg2[%c0_1, %c0_2] : memref<100x128xbf16, #tpu.memory_space<vmem>>, vector<100x128xbf16>
    %cst = arith.constant dense<0.000000e+00> : vector<8x128xf32>
    %3 = tpu.matmul %1, %2, %cst {dimension_numbers = #tpu.dot_dimension_numbers<[1], [0], [0], [1], [0, 0, 1, 1], [], []>} : vector<8x100xbf16>, vector<100x128xbf16>, vector<8x128xf32> -> vector<8x128xf32>
    %c0_3 = arith.constant 0 : index
    %c0_4 = arith.constant 0 : index
    %4 = vector.load %arg3[%c0_3, %c0_4] : memref<1x128xf32, #tpu.memory_space<vmem>>, vector<1x128xf32>
    %5 = vector.broadcast %4 : vector<1x128xf32> to vector<8x128xf32>
    %6 = arith.addf %3, %5 : vector<8x128xf32>
    %cst_5 = arith.constant 0.000000e+00 : f32
    %7 = vector.broadcast %cst_5 : f32 to vector<8x128xf32>
    %8 = arith.maximumf %6, %7 : vector<8x128xf32>
    %9 = arith.truncf %8 : vector<8x128xf32> to vector<8x128xbf16>
    %c0_6 = arith.constant 0 : index
    %c0_7 = arith.constant 0 : index
    %10 = vector.load %arg4[%c0_6, %c0_7] : memref<128x50xbf16, #tpu.memory_space<vmem>>, vector<128x50xbf16>
    %cst_8 = arith.constant dense<0.000000e+00> : vector<8x50xf32>
    %11 = tpu.matmul %9, %10, %cst_8 {dimension_numbers = #tpu.dot_dimension_numbers<[1], [0], [0], [1], [0, 0, 1, 1], [], []>} : vector<8x128xbf16>, vector<128x50xbf16>, vector<8x50xf32> -> vector<8x50xf32>
    %c0_9 = arith.constant 0 : index
    %c0_10 = arith.constant 0 : index
    %12 = vector.load %arg5[%c0_9, %c0_10] : memref<1x50xf32, #tpu.memory_space<vmem>>, vector<1x50xf32>
    %13 = vector.broadcast %12 : vector<1x50xf32> to vector<8x50xf32>
    %14 = arith.addf %11, %13 : vector<8x50xf32>
    %cst_11 = arith.constant 0.000000e+00 : f32
    %15 = vector.broadcast %cst_11 : f32 to vector<8x50xf32>
    %16 = arith.maximumf %14, %15 : vector<8x50xf32>
    %c0_12 = arith.constant 0 : index
    %c0_13 = arith.constant 0 : index
    %17 = vector.load %arg6[%c0_12, %c0_13] : memref<8x50xf32, #tpu.memory_space<vmem>>, vector<8x50xf32>
    tpu.vector_store %arg6[%c0_12, %c0_13], %16 {strides = array<i32>} : memref<8x50xf32, #tpu.memory_space<vmem>>, vector<8x50xf32>,
    return
  }
  func.func @transform_0(%arg0: i32) -> (i32, i32) {
    %c0_i32 = arith.constant 0 : i32
    %c0_i32_0 = arith.constant 0 : i32
    return %arg0, %c0_i32 : i32, i32
  }
  func.func @transform_1(%arg0: i32) -> (i32, i32) {
    %c0_i32 = arith.constant 0 : i32
    %c0_i32_0 = arith.constant 0 : i32
    %c0_i32_1 = arith.constant 0 : i32
    return %c0_i32, %c0_i32_0 : i32, i32
  }
  func.func @transform_2(%arg0: i32) -> (i32, i32) {
    %c0_i32 = arith.constant 0 : i32
    %c0_i32_0 = arith.constant 0 : i32
    %c0_i32_1 = arith.constant 0 : i32
    return %c0_i32, %c0_i32_0 : i32, i32
  }
  func.func @transform_3(%arg0: i32) -> (i32, i32) {
    %c0_i32 = arith.constant 0 : i32
    %c0_i32_0 = arith.constant 0 : i32
    %c0_i32_1 = arith.constant 0 : i32
    return %c0_i32, %c0_i32_0 : i32, i32
  }
  func.func @transform_4(%arg0: i32) -> (i32, i32) {
    %c0_i32 = arith.constant 0 : i32
    %c0_i32_0 = arith.constant 0 : i32
    %c0_i32_1 = arith.constant 0 : i32
    return %c0_i32, %c0_i32_0 : i32, i32
  }
  func.func @transform_5(%arg0: i32) -> (i32, i32) {
    %c0_i32 = arith.constant 0 : i32
    %c0_i32_0 = arith.constant 0 : i32
    return %arg0, %c0_i32 : i32, i32
  }
}

</mosaic_0001>

<bundles_post_ra>
// kernel: tpu_custom_call.1
= control target key start
LH: loop header
LB: loop body
LE: loop exit
PB: predicated region body
PF: predicated region fallthrough
CT: control target
= control target key end

     0   :  { %v376_v1 = vmov 0.0   ;;  %vm377_vm0 = vmmov 0   ;;  %s475_s0 = inlined_call_operand.vmem [shape: f32[8,100], index: 0, kind: input, shape index: {}]   ;;  %s476_s1 = inlined_call_operand.vmem [shape: bf16[100,128], index: 1, kind: input, shape index: {}]   ;;  %s477_s2 = inlined_call_operand.vmem [shape: f32[1,128], index: 2, kind: input, shape index: {}]   ;;  %s478_s3 = inlined_call_operand.vmem [shape: bf16[128,50], index: 3, kind: input, shape index: {}]   ;;  %s479_s4 = inlined_call_operand.vmem [shape: f32[1,50], index: 4, kind: input, shape index: {}]   ;;  %s480_s5 = inlined_call_operand.hbm [shape: f32[8,50], index: 5, kind: output, shape index: {}]  }
   0x1   :  { %v337_v0 = vld [vmem:[%s476_s1] sm:$0xff]   ;;  %296 = vmatprep.subr.bf16.mxu0 %v376_v1  ;;  %314 = vmatprep.subr.bf16.mxu1 %v376_v1  ;;  %v338_v2 = vld [vmem:[%s476_s1 + $0x8] sm:$0xff]   ;;  %v339_v3 = vld [vmem:[%s476_s1 + $0x10] sm:$0xff]  }
   0x2   :  { %297 = vmatpush3.bf16.msra.mxu0 %v337_v0  ;;  %310 = vmatprep.mubr.msk.bf16.mxu0 %vm377_vm0, %v376_v1  ;;  %v344_v4 = vld [vmem:[%s478_s3] sm:$0xff]   ;;  %v345_v5 = vld [vmem:[%s478_s3 + $0x8] sm:$0xff]   ;;  %v340_v6 = vld [vmem:[%s476_s1 + $0x18] sm:$0xff]  }
   0x3   :  { %298 = vmatprep.subr.bf16.mxu0 %v376_v1  ;;  %330 = vmatprep.mubr.msk.bf16.mxu1 %vm377_vm0, %v376_v1  ;;  %v341_v7 = vld [vmem:[%s476_s1 + $0x20] sm:$0xff]   ;;  %v346_v8 = vld [vmem:[%s478_s3 + $0x10] sm:$0xff]  }
   0x4   :  { %315 = vmatpush3.bf16.msra.mxu1 %v344_v4 }
   0x5   :  { %316 = vmatprep.subr.bf16.mxu1 %v376_v1 }
   0x6   :  { %299 = vmatpush3.bf16.msra.mxu0 %v338_v2 }
   0x7   :  { %300 = vmatprep.subr.bf16.mxu0 %v376_v1 }
   0x8   :  { %317 = vmatpush3.bf16.msra.mxu1 %v345_v5 }
   0x9   :  { %318 = vmatprep.subr.bf16.mxu1 %v376_v1 }
   0xa   :  { %301 = vmatpush3.bf16.msra.mxu0 %v339_v3 }
   0xb   :  { %302 = vmatprep.subr.bf16.mxu0 %v376_v1 }
   0xe   :  { %303 = vmatpush3.bf16.msra.mxu0 %v340_v6 }
   0xf   :  { %10 = vsyncpa [#allocation3], 0  ;;  %304 = vmatprep.subr.bf16.mxu0 %v376_v1  ;;  %319 = vmatpush3.bf16.msra.mxu1 %v346_v8  ;;  %v347_v9 = vld [vmem:[%s478_s3 + $0x18] sm:$0xff]   ;;  %v342_v10 = vld [vmem:[%s476_s1 + $0x28] sm:$0xff]   ;;  %vm87_vm1 = vcmask 1041408   ;;  %vm83_vm2 = vcmask 818176  }
  0x10   :  { %320 = vmatprep.subr.bf16.mxu1 %v376_v1  ;;  %v343_v11 = vld [vmem:[%s476_s1 + $0x30] ss:$0 sps:$4 sm:$0x33]   ;;  %v348_v12 = vld [vmem:[%s478_s3 + $0x20] sm:$0xff]   ;;  %v349_v16 = vld [vmem:[%s478_s3 + $0x28] sm:$0xff]   ;;  %s378_s27 = smov [#allocation2]  }
  0x11   :  { %v22_v13 = vld [vmem:[%s475_s0] sm:$0xff]  ;;  %v89_v14 = vsel %vm87_vm1, %v343_v11, 0  ;;  %v350_v17 = vld [vmem:[%s478_s3 + $0x30] sm:$0xff]   ;;  %v351_v18 = vld [vmem:[%s478_s3 + $0x38] sm:$0xff]   ;;  %s253_s3 = sshll.u32 %s378_s27, 4  ;;  %vm245_vm3 = vcmask 408576   ;;  %s254_s3 = int_to_ptr.vmem [resolvable:$true] %s253_s3 }
  0x12   :  { %305 = vmatpush3.bf16.msra.mxu0 %v341_v7  ;;  %v23_v15 = vpack.c.bf16 %v22_v13, %v22_v13  ;;  %v261_v19 = vld [vmem:[%s477_s2] ss:$0 sm:$0xff]  ;;  %s352_s2 = scalar_lea.vmem %s254_s3, 128  ;;  %p357_p1 = scmp.lt.s32.totalorder %s254_s3, %s254_s3 }
  0x13   :  { %306 = vmatprep.subr.bf16.mxu0 %v376_v1  ;;  %321 = vmatpush3.bf16.msra.mxu1 %v347_v9  ;;  %v270_v27 = vld [vmem:[%s479_s4] ss:$0 sm:$0xff]  ;;  %p353_p0 = scmp.ne.s32.totalorder %s254_s3, %s352_s2  ;;  %p358_p2 = scmp.lt.s32.totalorder %s352_s2, %s352_s2 }
  0x14   :  { %322 = vmatprep.subr.bf16.mxu1 %v376_v1 }
  0x15   :  { %p359_p3 = por %p358_p2, %p357_p1 }
  0x16   :  { %307 = vmatpush3.bf16.msra.mxu0 %v342_v10 }
  0x17   :  { %308 = vmatprep.subr.bf16.mxu0 %v376_v1  ;;  %323 = vmatpush3.bf16.msra.mxu1 %v348_v12  ;;  %p360_p4 = pnand %p359_p3, %p353_p0 }
  0x18   :  { %324 = vmatprep.subr.bf16.mxu1 %v376_v1 }
  0x1a   :  { %309 = vmatpush3.bf16.msra.mxu0 %v89_v14 }
  0x1b   :  { %325 = vmatpush3.bf16.msra.mxu1 %v349_v16 }
  0x1c   :  { %326 = vmatprep.subr.bf16.mxu1 %v376_v1 }
  0x1d   :  { %311 = vmatmul.mubr.msk.bf16.vlgmr.msra.gmra.mrb[0].mxu0 %vm83_vm2, %v23_v15 }
  0x1f   :  { %327 = vmatpush3.bf16.msra.mxu1 %v350_v17 }
  0x20   :  { %328 = vmatprep.subr.bf16.mxu1 %v376_v1 }
  0x23   :  { %329 = vmatpush3.bf16.msra.mxu1 %v351_v18 }
  0xf0   :  { %v125_v20 = vpop.f32.mrb[0].mxu0 }
  0xf1   :  { %v126_v21 = vadd.f32 %v261_v19, %v125_v20  ;;  %v312_v22 = vpop.f32.mrb[1].mxu0 }
  0xf2   :  { %v128_v23 = vpop.f32.mrb[2].mxu0 }
  0xf3   :  { %v131_v24 = vmax.f32 %v126_v21, 0.0  ;;  %v313_v25 = vpop.f32.mrb[3].mxu0 }
  0xf5   :  { %v132_v26 = vpack.c.bf16 %v131_v24, %v131_v24 }
  0xf7   :  { %331 = vmatmul.mubr.bf16.vlgmr.msra.gmra.mrb[0].mxu1 %v132_v26 }
 0x1ca   :  { %v238_v28 = vpop.f32.mrb[0].mxu1 }
 0x1cb   :  { %v239_v29 = vadd.f32 %v270_v27, %v238_v28  ;;  %v332_v30 = vpop.f32.mrb[1].mxu1 }
 0x1cc   :  { %v241_v31 = vpop.f32.mrb[2].mxu1 }
 0x1cd   :  { %v244_v32 = vmax.f32 %v239_v29, 0.0  ;;  %v333_v33 = vpop.f32.mrb[3].mxu1 }
 0x1cf   :  { %246 = vst.msk [vmem:[#allocation2] sm:$0xff] %vm245_vm3, %v244_v32 }
 0x1d0   :  { %363 = shalt.err (!%p360_p4)
}
 0x1d1   :  { %s364_s29 = scalar_lea.hbm %s480_s5, 128 }
 0x1d2   :  { %p365_p5 = scmp.ne.s32.totalorder %s480_s5, %s364_s29  ;;  %p368_p6 = scmp.lt.u32.totalorder %s364_s29, %s480_s5 }
 0x1d4   :  { %p370_p7 = pnand %p368_p6, %p365_p5 }
 0x1d6   :  { %373 = shalt.err (!%p370_p7)
}
 0x1d7   :  { %256 = dma.vmem_to_hbm [thread:$0]  %s254_s3, 128, %s480_s5, [#allocation3]  }
 0x1d8   :  { %374 = dma.done.wait [#allocation3], 128  }
 0x1d9   :  { %375 = vsyncadd [#allocation3], 4294967168 }
 0x1da   :  { %260 = vsyncpa [#allocation3], 1 }

</bundles_post_ra>
